<compile_context>
chip_gen: v5e
topology: v5e:2x2
jax: 0.10.0
libtpu: 0.0.40
codegen_flags: <defaults>
</compile_context>

<pallas_src>
import jax
import jax.numpy as jnp
from jax import lax
from jax.experimental import pallas as pl
from jax.experimental.pallas import tpu as pltpu

_LANE = 128
_SUBLANE = 8


def _round_up(x, m):
    return (x + m - 1) // m * m


def _critic_kernel(x_ref, w1_ref, b1_ref, w2_ref, b2_ref, w3_ref, b3_ref, o_ref):
    """All three layers fused per batch tile.

    x_ref : (tile_b, D)   f32     w1_ref: (D, F1p)   bf16   b1_ref: (1, F1p) f32
    w2_ref: (F1p, F2p)    bf16    b2_ref: (1, F2p)   f32
    w3_ref: (1, F2p)      f32     b3_ref: (1, 1)     f32 (SMEM scalar)
    o_ref : (1, tile_b)   f32     (lane-dense: batch on the lane axis)
    """
    # Layer 1: bf16 MXU matmul (K = D = 16, unpadded), f32 accumulate + bias + ReLU.
    x = x_ref[...].astype(jnp.bfloat16)
    h1 = jnp.dot(x, w1_ref[...], preferred_element_type=jnp.float32) + b1_ref[...]
    h1 = jnp.maximum(h1, 0.0)

    # Layer 2: same.
    h2 = jnp.dot(h1.astype(jnp.bfloat16), w2_ref[...],
                 preferred_element_type=jnp.float32) + b2_ref[...]
    h2 = jnp.maximum(h2, 0.0)

    # Layer 3 (fc2 -> 1): contract (1, F2p) x (tile_b, F2p) over F2p -> (1, tile_b).
    # Lands lane-dense directly; no rank-1 intermediate, no relayout before store.
    v = lax.dot_general(w3_ref[...], h2,
                        dimension_numbers=(((1,), (1,)), ((), ())),
                        preferred_element_type=jnp.float32)
    o_ref[...] = v + b3_ref[0, 0]


def _pick_tile_b(B8):
    """Default batch tile: big enough to amortize the per-grid-step overhead,
    a multiple of 128 whenever the batch is tiled, and >= 2 grid steps for
    larger batches so both v7x TensorCores get work."""
    if B8 <= 256:
        return B8                       # one small tile; no point splitting
    Bp128 = _round_up(B8, _LANE)
    half = max(_LANE, (Bp128 // 2) // _LANE * _LANE)
    return min(2048, half)


def critic_forward(state, packed, *, tile_b=None):
    """state: [B, D] float32 (D = input_dims, unpadded).
    packed: output of pack_params (lane-padded weights)."""
    B, D = state.shape
    Dw, F1p = packed["w1"].shape
    F2p = packed["w2"].shape[1]
    assert D == Dw, f"state feature dim {D} != packed w1 rows {Dw}"

    # --- batch tiling ---
    B8 = _round_up(B, _SUBLANE)
    if tile_b is None:
        tile_b = _pick_tile_b(B8)
    assert tile_b % _SUBLANE == 0, "tile_b must be a multiple of 8 (f32 sublanes)"
    Bp = _round_up(B, tile_b)
    if Bp > tile_b:
        assert tile_b % _LANE == 0, \
            "tile_b must be a multiple of 128 when the batch is tiled"
    grid = (Bp // tile_b,)

    # --- batch pad only when needed; D is NOT padded, so this is a tiny copy ---
    xp = state
    if Bp != B:
        xp = jnp.zeros((Bp, D), state.dtype).at[:B, :].set(state)

    out = pl.pallas_call(
        _critic_kernel,
        out_shape=jax.ShapeDtypeStruct((1, Bp), jnp.float32),
        grid_spec=pltpu.PrefetchScalarGridSpec(
            num_scalar_prefetch=0,
            grid=grid,
            in_specs=[
                pl.BlockSpec((tile_b, D), lambda i: (i, 0)),      # state tile (K unpadded)
                pl.BlockSpec((D, F1p), lambda i: (0, 0)),         # w1 (bf16)
                pl.BlockSpec((1, F1p), lambda i: (0, 0)),         # b1
                pl.BlockSpec((F1p, F2p), lambda i: (0, 0)),       # w2 (bf16)
                pl.BlockSpec((1, F2p), lambda i: (0, 0)),         # b2
                pl.BlockSpec((1, F2p), lambda i: (0, 0)),         # w3 row (f32)
                pl.BlockSpec(memory_space=pltpu.SMEM),            # b3 scalar
            ],
            out_specs=pl.BlockSpec((1, tile_b), lambda i: (0, i)),
        ),
        compiler_params=pltpu.CompilerParams(
            dimension_semantics=("parallel",),
        ),
    )(xp, packed["w1"], packed["b1"], packed["w2"], packed["b2"],
      packed["w3"], packed["b3"])

    return out.reshape(Bp, 1)[:B]


def init_params(key, input_dims, fc1_dims, fc2_dims):
    """nn.Linear-style init (uniform +-1/sqrt(fan_in)); weights stored (in, out), f32."""
    def linear(k, fan_in, fan_out):
        kw, kb = jax.random.split(k)
        bound = 1.0 / jnp.sqrt(jnp.float32(fan_in))
        w = jax.random.uniform(kw, (fan_in, fan_out), jnp.float32, -bound, bound)
        b = jax.random.uniform(kb, (1, fan_out), jnp.float32, -bound, bound)
        return w, b

    k1, k2, k3 = jax.random.split(key, 3)
    w1, b1 = linear(k1, input_dims, fc1_dims)
    w2, b2 = linear(k2, fc1_dims, fc2_dims)
    w3, b3 = linear(k3, fc2_dims, 1)
    return {"w1": w1, "b1": b1, "w2": w2, "b2": b2, "w3": w3, "b3": b3}


def pack_params(p):
    """Pad *output* feature dims to lane multiples (128) only, cast MXU weights
    to bf16, and lay w3 out as a (1, fc2) row.  The contraction dim of layer 1
    (the state feature dim) is deliberately left unpadded so the state never
    needs a padded copy.  Done once, at init time."""
    D, F1 = p["w1"].shape
    F2 = p["w2"].shape[1]
    F1p, F2p = (_round_up(d, _LANE) for d in (F1, F2))

    def pad2(a, rows, cols):
        return jnp.zeros((rows, cols), a.dtype).at[:a.shape[0], :a.shape[1]].set(a)

    return {
        "w1": pad2(p["w1"], D, F1p).astype(jnp.bfloat16),   # (D, F1p): K unpadded
        "b1": pad2(p["b1"], 1, F1p),
        "w2": pad2(p["w2"], F1p, F2p).astype(jnp.bfloat16),
        "b2": pad2(p["b2"], 1, F2p),
        "w3": pad2(p["w3"].T, 1, F2p),                      # (1, F2p) f32 row
        "b3": p["b3"].reshape(1, 1),                        # SMEM scalar
    }


def critic_forward_ref_f32(state, p):
    h1 = jnp.maximum(state @ p["w1"] + p["b1"], 0.0)
    h2 = jnp.maximum(h1 @ p["w2"] + p["b2"], 0.0)
    return h2 @ p["w3"] + p["b3"]


def critic_forward_ref_bf16(state, p):
    """Pure-JAX reference matching the kernel's numerics (bf16 MXU operands,
    f32 accumulation, f32 epilogue, f32 layer-3 contraction)."""
    h1 = jnp.dot(state.astype(jnp.bfloat16), p["w1"].astype(jnp.bfloat16),
                 preferred_element_type=jnp.float32) + p["b1"]
    h1 = jnp.maximum(h1, 0.0)
    h2 = jnp.dot(h1.astype(jnp.bfloat16), p["w2"].astype(jnp.bfloat16),
                 preferred_element_type=jnp.float32) + p["b2"]
    h2 = jnp.maximum(h2, 0.0)
    v = jnp.dot(h2, p["w3"].astype(jnp.float32),
                preferred_element_type=jnp.float32)
    return v + p["b3"]


if __name__ == "__main__":
    key = jax.random.PRNGKey(0)
    k_params, k_a, k_b, k_c = jax.random.split(key, 4)

    # Shapes consistent with the module: input_dims=(16,), fc1=32, fc2=32.
    B, input_dims, fc1_dims, fc2_dims = 8, 16, 32, 32

    params = init_params(k_params, input_dims, fc1_dims, fc2_dims)
    packed = pack_params(params)

    # (A) Small batch: single tile, no padding.
    state = jax.random.normal(k_a, (B, input_dims), jnp.float32)
    value = jax.block_until_ready(critic_forward(state, packed))
    assert value.shape == (B, 1)
    ref_bf16 = critic_forward_ref_bf16(state, params)
    ref_f32 = critic_forward_ref_f32(state, params)
    assert jnp.allclose(value, ref_bf16, atol=1e-3, rtol=1e-3), "mismatch vs bf16 reference"
    assert jnp.allclose(value, ref_f32, atol=5e-2, rtol=5e-2), "mismatch vs f32 reference"

    # (B) Non-multiple batch with the default tile selection: exercises the
    #     auto tile_b (128), multi-step grid, and batch tail padding.
    B2 = 300
    state2 = jax.random.normal(k_b, (B2, input_dims), jnp.float32)
    value2 = jax.block_until_ready(critic_forward(state2, packed))
    assert value2.shape == (B2, 1)
    ref2 = critic_forward_ref_bf16(state2, params)
    assert jnp.allclose(value2, ref2, atol=1e-3, rtol=1e-3), "mismatch (auto-tiled batch)"

    # (C) Larger batch: auto tile_b -> 768 rows, 2 grid steps (both TCs on v7x),
    #     no padding.
    B3 = 1536
    state3 = jax.random.normal(k_c, (B3, input_dims), jnp.float32)
    value3 = jax.block_until_ready(critic_forward(state3, packed))
    assert value3.shape == (B3, 1)
    ref3 = critic_forward_ref_bf16(state3, params)
    assert jnp.allclose(value3, ref3, atol=1e-3, rtol=1e-3), "mismatch (large-tile batch)"

    # TODO(synk): training side (Adam optimizer step / backward) is out of scope here.
    print("KERNEL_OK")
</pallas_src>

<mosaic_0001>
module attributes {stable_mosaic.version = 11 : i64} {
  func.func @_critic_kernel(%arg0: i32, %arg1: memref<8x16xf32, #tpu.memory_space<vmem>>, %arg2: memref<16x128xbf16, #tpu.memory_space<vmem>>, %arg3: memref<1x128xf32, #tpu.memory_space<vmem>>, %arg4: memref<128x128xbf16, #tpu.memory_space<vmem>>, %arg5: memref<1x128xf32, #tpu.memory_space<vmem>>, %arg6: memref<1x128xf32, #tpu.memory_space<vmem>>, %arg7: memref<1x1xf32, #tpu.memory_space<smem>>, %arg8: memref<1x8xf32, #tpu.memory_space<vmem>>) attributes {dimension_semantics = [#tpu.dimension_semantics<parallel>], iteration_bounds = array<i64: 1>, scalar_prefetch = 0 : i64, scratch_operands = 0 : i64, tpu.core_type = #tpu.core_type<tc>, window_params = [{transform_indices = @transform_0, window_bounds = array<i64: 8, 16>}, {pipeline_mode = #tpu.pipeline_mode<synchronous>, transform_indices = @transform_1, window_bounds = array<i64: 16, 128>}, {pipeline_mode = #tpu.pipeline_mode<synchronous>, transform_indices = @transform_2, window_bounds = array<i64: 1, 128>}, {pipeline_mode = #tpu.pipeline_mode<synchronous>, transform_indices = @transform_3, window_bounds = array<i64: 128, 128>}, {pipeline_mode = #tpu.pipeline_mode<synchronous>, transform_indices = @transform_4, window_bounds = array<i64: 1, 128>}, {pipeline_mode = #tpu.pipeline_mode<synchronous>, transform_indices = @transform_5, window_bounds = array<i64: 1, 128>}, {transform_indices = @transform_6, window_bounds = array<i64: 1, 1>}, {transform_indices = @transform_7, window_bounds = array<i64: 1, 8>}]} {
    %c0 = arith.constant 0 : index
    %c0_0 = arith.constant 0 : index
    %0 = vector.load %arg1[%c0, %c0_0] : memref<8x16xf32, #tpu.memory_space<vmem>>, vector<8x16xf32>
    %1 = arith.truncf %0 : vector<8x16xf32> to vector<8x16xbf16>
    %c0_1 = arith.constant 0 : index
    %c0_2 = arith.constant 0 : index
    %2 = vector.load %arg2[%c0_1, %c0_2] : memref<16x128xbf16, #tpu.memory_space<vmem>>, vector<16x128xbf16>
    %cst = arith.constant dense<0.000000e+00> : vector<8x128xf32>
    %3 = tpu.matmul %1, %2, %cst {dimension_numbers = #tpu.dot_dimension_numbers<[1], [0], [0], [1], [0, 0, 1, 1], [], []>} : vector<8x16xbf16>, vector<16x128xbf16>, vector<8x128xf32> -> vector<8x128xf32>
    %c0_3 = arith.constant 0 : index
    %c0_4 = arith.constant 0 : index
    %4 = vector.load %arg3[%c0_3, %c0_4] : memref<1x128xf32, #tpu.memory_space<vmem>>, vector<1x128xf32>
    %5 = vector.broadcast %4 : vector<1x128xf32> to vector<8x128xf32>
    %6 = arith.addf %3, %5 : vector<8x128xf32>
    %cst_5 = arith.constant 0.000000e+00 : f32
    %7 = vector.broadcast %cst_5 : f32 to vector<8x128xf32>
    %8 = arith.maximumf %6, %7 : vector<8x128xf32>
    %9 = arith.truncf %8 : vector<8x128xf32> to vector<8x128xbf16>
    %c0_6 = arith.constant 0 : index
    %c0_7 = arith.constant 0 : index
    %10 = vector.load %arg4[%c0_6, %c0_7] : memref<128x128xbf16, #tpu.memory_space<vmem>>, vector<128x128xbf16>
    %cst_8 = arith.constant dense<0.000000e+00> : vector<8x128xf32>
    %11 = tpu.matmul %9, %10, %cst_8 {dimension_numbers = #tpu.dot_dimension_numbers<[1], [0], [0], [1], [0, 0, 1, 1], [], []>} : vector<8x128xbf16>, vector<128x128xbf16>, vector<8x128xf32> -> vector<8x128xf32>
    %c0_9 = arith.constant 0 : index
    %c0_10 = arith.constant 0 : index
    %12 = vector.load %arg5[%c0_9, %c0_10] : memref<1x128xf32, #tpu.memory_space<vmem>>, vector<1x128xf32>
    %13 = vector.broadcast %12 : vector<1x128xf32> to vector<8x128xf32>
    %14 = arith.addf %11, %13 : vector<8x128xf32>
    %cst_11 = arith.constant 0.000000e+00 : f32
    %15 = vector.broadcast %cst_11 : f32 to vector<8x128xf32>
    %16 = arith.maximumf %14, %15 : vector<8x128xf32>
    %c0_12 = arith.constant 0 : index
    %c0_13 = arith.constant 0 : index
    %17 = vector.load %arg6[%c0_12, %c0_13] : memref<1x128xf32, #tpu.memory_space<vmem>>, vector<1x128xf32>
    %cst_14 = arith.constant dense<0.000000e+00> : vector<1x8xf32>
    %18 = tpu.matmul %17, %16, %cst_14 {dimension_numbers = #tpu.dot_dimension_numbers<[1], [1], [0], [0], [0, 0, 1, 0], [], []>} : vector<1x128xf32>, vector<8x128xf32>, vector<1x8xf32> -> vector<1x8xf32>
    %c0_15 = arith.constant 0 : index
    %c0_16 = arith.constant 0 : index
    %19 = memref.load %arg7[%c0_15, %c0_16] : memref<1x1xf32, #tpu.memory_space<smem>>
    %20 = vector.broadcast %19 : f32 to vector<1x8xf32>
    %21 = arith.addf %18, %20 : vector<1x8xf32>
    %c0_17 = arith.constant 0 : index
    %c0_18 = arith.constant 0 : index
    %22 = vector.load %arg8[%c0_17, %c0_18] : memref<1x8xf32, #tpu.memory_space<vmem>>, vector<1x8xf32>
    tpu.vector_store %arg8[%c0_17, %c0_18], %21 {strides = array<i32>} : memref<1x8xf32, #tpu.memory_space<vmem>>, vector<1x8xf32>,
    return
  }
  func.func @transform_0(%arg0: i32) -> (i32, i32) {
    %c0_i32 = arith.constant 0 : i32
    %c0_i32_0 = arith.constant 0 : i32
    return %arg0, %c0_i32 : i32, i32
  }
  func.func @transform_1(%arg0: i32) -> (i32, i32) {
    %c0_i32 = arith.constant 0 : i32
    %c0_i32_0 = arith.constant 0 : i32
    %c0_i32_1 = arith.constant 0 : i32
    return %c0_i32, %c0_i32_0 : i32, i32
  }
  func.func @transform_2(%arg0: i32) -> (i32, i32) {
    %c0_i32 = arith.constant 0 : i32
    %c0_i32_0 = arith.constant 0 : i32
    %c0_i32_1 = arith.constant 0 : i32
    return %c0_i32, %c0_i32_0 : i32, i32
  }
  func.func @transform_3(%arg0: i32) -> (i32, i32) {
    %c0_i32 = arith.constant 0 : i32
    %c0_i32_0 = arith.constant 0 : i32
    %c0_i32_1 = arith.constant 0 : i32
    return %c0_i32, %c0_i32_0 : i32, i32
  }
  func.func @transform_4(%arg0: i32) -> (i32, i32) {
    %c0_i32 = arith.constant 0 : i32
    %c0_i32_0 = arith.constant 0 : i32
    %c0_i32_1 = arith.constant 0 : i32
    return %c0_i32, %c0_i32_0 : i32, i32
  }
  func.func @transform_5(%arg0: i32) -> (i32, i32) {
    %c0_i32 = arith.constant 0 : i32
    %c0_i32_0 = arith.constant 0 : i32
    %c0_i32_1 = arith.constant 0 : i32
    return %c0_i32, %c0_i32_0 : i32, i32
  }
  func.func @transform_6(%arg0: i32) -> (i32, i32) {
    %c0_i32 = arith.constant 0 : i32
    %c0_i32_0 = arith.constant 0 : i32
    %c0_i32_1 = arith.constant 0 : i32
    return %c0_i32, %c0_i32_0 : i32, i32
  }
  func.func @transform_7(%arg0: i32) -> (i32, i32) {
    %c0_i32 = arith.constant 0 : i32
    %c0_i32_0 = arith.constant 0 : i32
    return %c0_i32, %arg0 : i32, i32
  }
}

</mosaic_0001>

<bundles_post_ra>
// kernel: tpu_custom_call.1
= control target key start
LH: loop header
LB: loop body
LE: loop exit
PB: predicated region body
PF: predicated region fallthrough
CT: control target
= control target key end

     0   :  { %13 = vsyncpa [#allocation4], 0  ;;  %s458_s0 = inlined_call_operand.hbm [shape: f32[8,16], index: 0, kind: input, shape index: {}]   ;;  %s459_s1 = inlined_call_operand.hbm [shape: bf16[16,128], index: 1, kind: input, shape index: {}]   ;;  %s460_s2 = inlined_call_operand.vmem [shape: f32[1,128], index: 2, kind: input, shape index: {}]   ;;  %s461_s3 = inlined_call_operand.hbm [shape: bf16[128,128], index: 3, kind: input, shape index: {}]   ;;  %s462_s4 = inlined_call_operand.vmem [shape: f32[1,128], index: 4, kind: input, shape index: {}]   ;;  %s463_s5 = inlined_call_operand.vmem [shape: f32[1,128], index: 5, kind: input, shape index: {}]   ;;  %s464_s6 = inlined_call_operand.<no memory space> [shape: f32[1,1], index: 6, kind: input, shape index: {}]   ;;  %s465_s7 = inlined_call_operand.hbm [shape: f32[1,8], index: 7, kind: output, shape index: {}]  }
   0x1   :  { %14 = vsyncpa [#allocation7], 0  ;;  %s31_s26 = sshll.u32 %s459_s1, 4  ;;  %s32_s26 = int_to_ptr.hbm [resolvable:$true] %s31_s26 }
   0x2   :  { %15 = vsyncpa [#allocation5], 0  ;;  %s388_s27 = smov [#allocation6]   ;;  %s21_s8 = sshll.u32 %s458_s0, 4  ;;  %s22_s8 = int_to_ptr.hbm [resolvable:$true] %s21_s8 }
   0x3   :  { %s33_s28 = sshll.u32 %s388_s27, 4  ;;  %s389_s9 = smov 64   ;;  %s34_s28 = int_to_ptr.vmem [resolvable:$true] %s33_s28 }
   0x4   :  { %s390_s10 = smov 4   ;;  %s391_s11 = smov [#allocation3]  }
   0x5   :  { %39 = dma.hbm_to_vmem [thread:$0]  %s32_s26, 128, %s34_s28, [#allocation7], %s389_s9, %s389_s9, %s390_s10  }
   0x6   :  { %s23_s12 = sshll.u32 %s391_s11, 4  ;;  %s46_s15 = sshll.u32 %s461_s3, 4  ;;  %s24_s12 = int_to_ptr.vmem [resolvable:$true] %s23_s12  ;;  %s47_s15 = int_to_ptr.hbm [resolvable:$true] %s46_s15 }
   0x7   :  { %26 = dma.hbm_to_vmem [thread:$0]  %s22_s8, 128, %s24_s12, [#allocation4]  }
   0x8   :  { %s392_s1 = smov [#allocation8]  }
   0x9   :  { %s48_s16 = sshll.u32 %s392_s1, 4  ;;  %s49_s16 = int_to_ptr.vmem [resolvable:$true] %s48_s16 }
   0xa   :  { %54 = dma.hbm_to_vmem [thread:$0]  %s47_s15, 1024, %s49_s16, [#allocation7], %s389_s9, %s389_s9, %s390_s10  }
   0xb   :  { %382 = dma.done.wait [#allocation4], 128  }
   0xc   :  { %383 = vsyncadd [#allocation4], 4294967168 }
   0xd   :  { %384 = dma.done.wait [#allocation7], 1152  }
   0xe   :  { %385 = vsyncadd [#allocation7], 4294966144  ;;  %v269_v0 = vld [vmem:[#allocation6] sm:$0xff]  ;;  %v74_v1 = vld [vmem:[#allocation3] sm:$0xff]  ;;  %vm88_vm0 = vcmask 130048   ;;  %v191_v23 = vstv %s464_s6  ;;  %s393_s22 = smov [#allocation9]  }
   0xf   :  { %v277_v2 = vld [vmem:[#allocation8 + $0x38] sm:$0xff]  ;;  %v75_v3 = vpack.c.bf16 %v74_v1, %v74_v1  ;;  %99 = vmatpush.bf16.msra.mxu0 %v269_v0  ;;  %v276_v4 = vld [vmem:[#allocation8 + $0x30] sm:$0xff]  ;;  %v275_v5 = vld [vmem:[#allocation8 + $0x28] sm:$0xff]  ;;  %s219_s23 = sshll.u32 %s393_s22, 4  ;;  %vm212_vm1 = vcmask 57344   ;;  %s220_s23 = int_to_ptr.vmem [resolvable:$true] %s219_s23 }
  0x10   :  { %175 = vmatpush.bf16.msra.mxu1 %v277_v2  ;;  %v274_v6 = vld [vmem:[#allocation8 + $0x20] sm:$0xff]  ;;  %v273_v7 = vld [vmem:[#allocation8 + $0x18] sm:$0xff]  ;;  %v272_v8 = vld [vmem:[#allocation8 + $0x10] sm:$0xff] }
  0x11   :  { %v271_v9 = vld [vmem:[#allocation8 + $0x8] sm:$0xff]  ;;  %v270_v10 = vld [vmem:[#allocation8] sm:$0xff]  ;;  %v284_v11 = vld [vmem:[%s460_s2] ss:$0 sm:$0xff] }
  0x12   :  { %236 = vmatmul.msk.bf16.vlgmr.msra.gmra.mxu0 %vm88_vm0, %v75_v3  ;;  %v285_v17 = vld [vmem:[%s462_s4] ss:$0 sm:$0xff]  ;;  %s221_s4 = sshll.u32 %s465_s7, 4  ;;  %s222_s4 = int_to_ptr.hbm [resolvable:$true] %s221_s4 }
  0x13   :  { %v189_v21 = vld [vmem:[%s463_s5] sm:$0x1] }
  0x14   :  { %176 = vmatpush.bf16.msra.mxu1 %v276_v4 }
  0x18   :  { %177 = vmatpush.bf16.msra.mxu1 %v275_v5 }
  0x1c   :  { %178 = vmatpush.bf16.msra.mxu1 %v274_v6 }
  0x20   :  { %179 = vmatpush.bf16.msra.mxu1 %v273_v7 }
  0x24   :  { %180 = vmatpush.bf16.msra.mxu1 %v272_v8 }
  0x28   :  { %181 = vmatpush.bf16.msra.mxu1 %v271_v9 }
  0x2c   :  { %182 = vmatpush.bf16.msra.mxu1 %v270_v10 }
  0x8f   :  { %v101_v12 = vpop.f32.mrf.mxu0 }
  0x90   :  { %v102_v13 = vadd.f32 %v284_v11, %v101_v12 }
  0x92   :  { %v105_v14 = vmax.f32 %v102_v13, 0.0 }
  0x94   :  { %v106_v15 = vpack.c.bf16 %v105_v14, %v105_v14 }
  0x96   :  { %183 = vmatmul.bf16.vlgmr.msra.gmra.mxu1 %v106_v15 }
  0x97   :  { %v103_v16 = vpop.f32.mrf.mxu0 }
 0x113   :  { %v184_v18 = vpop.f32.mrf.mxu1 }
 0x114   :  { %v185_v19 = vadd.f32 %v285_v17, %v184_v18 }
 0x116   :  { %v188_v20 = vmax.f32 %v185_v19, 0.0 }
 0x118   :  { %207 = vmatpush.xpose.msra.mxu2 %v188_v20 }
 0x11b   :  { %v186_v22 = vpop.f32.mrf.mxu1  ;;  %208 = vmatmul.f32.vlgmr.msra.gmra.mxu2 %v189_v21 }
 0x19e   :  { %v209_v24 = vpop.f32.mrf.mxu2 }
 0x19f   :  { %v210_v25 = vadd.f32 %v209_v24, %v191_v23 }
 0x1a1   :  { %213 = vst.msk [vmem:[#allocation9] sm:$0x1] %vm212_vm1, %v210_v25 }
 0x1a2   :  { %224 = dma.vmem_to_hbm [thread:$0]  %s220_s23, 16, %s222_s4, [#allocation5]  }
 0x1a3   :  { %386 = dma.done.wait [#allocation5], 16  }
 0x1a4   :  { %387 = vsyncadd [#allocation5], 4294967280 }
 0x1a5   :  { %229 = vsyncpa [#allocation4], 1 }
 0x1a6   :  { %230 = vsyncpa [#allocation7], 1 }
 0x1a7   :  { %231 = vsyncpa [#allocation5], 1 }

</bundles_post_ra>
